<compile_context>
chip_gen: v7x
topology: tpu7x:2x2x1
jax: 0.10.0
libtpu: 0.0.40
codegen_flags: <defaults>
</compile_context>

<pallas_src>
import math

import jax
import jax.numpy as jnp
from jax import lax
from jax.experimental import pallas as pl
from jax.experimental.pallas import tpu as pltpu

# ----------------------- model dimensions (small) ---------------------------
T = 8        # sequence length
B = 2        # batch
C = 32       # encoder_embed_dim
H = 4        # encoder_attention_heads
DH = C // H  # head dim
F = 64       # encoder_ffn_embed_dim
HT = H * T   # stacked (head, key) axis
SCALING = DH ** -0.5
LN_EPS = 1e-5

# Set to jnp.bfloat16 on v6e/v7x at production sizes (matmul operands only).
MXU_DTYPE = jnp.float32


# ------------------------------- kernel -------------------------------------
def _mm(a, b):
    return jnp.dot(a.astype(MXU_DTYPE), b.astype(MXU_DTYPE),
                   preferred_element_type=jnp.float32)


def _layer_norm(v, g, b):
    # torch.nn.LayerNorm: biased variance over last dim.
    mean = jnp.mean(v, axis=-1, keepdims=True)
    var = jnp.mean((v - mean) ** 2, axis=-1, keepdims=True)
    return (v - mean) * lax.rsqrt(var + LN_EPS) * g + b


def encoder_layer_kernel(x_ref, kbias_ref,
                         wz_ref, bz_ref, bo_ref,
                         ln1g_ref, ln1b_ref,
                         w1_ref, b1_ref, w2_ref, b2_ref,
                         ln2g_ref, ln2b_ref,
                         out_ref,
                         kstack_ref, vstack_ref, p_ref):
    x = x_ref[...]                                     # [T, C]

    # ---- fused projection: [ q*scale | k | per-head (v @ out_proj) ] --------
    z = _mm(x, wz_ref[...]) + bz_ref[...]              # [T, 2C + H*C]
    q = z[:, :C]                                       # [T, C]
    k = z[:, C:2 * C]                                  # [T, C]
    vo = z[:, 2 * C:]                                  # [T, H*C] lane-dense

    # ---- stack heads along sublanes (static sub-slice writes, no concat) ----
    # kstack[h*T + j, :] = k[j] restricted to head h's channels (zeros else)
    # vstack[h*T + j, :] = (v_h @ Wo_h.T)[j]
    kstack_ref[...] = jnp.zeros(kstack_ref.shape, kstack_ref.dtype)
    for h in range(H):
        kstack_ref[h * T:(h + 1) * T, h * DH:(h + 1) * DH] = (
            k[:, h * DH:(h + 1) * DH])
        vstack_ref[h * T:(h + 1) * T, :] = vo[:, h * C:(h + 1) * C]

    # ---- all-head scores with ONE matmul: [T, C] x [HT, C] -> [T, HT] -------
    s = lax.dot_general(q.astype(MXU_DTYPE), kstack_ref[...].astype(MXU_DTYPE),
                        (((1,), (1,)), ((), ())),
                        preferred_element_type=jnp.float32)
    s = s + kbias_ref[...]                             # key-padding bias [1, HT]

    # ---- per-head softmax over the key axis (exact; f32) --------------------
    for h in range(H):
        sh = s[:, h * T:(h + 1) * T]
        sh = sh - jnp.max(sh, axis=-1, keepdims=True)
        eh = jnp.exp(sh)
        p_ref[:, h * T:(h + 1) * T] = eh / jnp.sum(eh, axis=-1, keepdims=True)

    # ---- all-head context + out_proj with ONE matmul ------------------------
    attn = _mm(p_ref[...], vstack_ref[...]) + bo_ref[...]        # [T, C]

    # ---- residual + post-LayerNorm #1 ----
    x1 = _layer_norm(x + attn, ln1g_ref[...], ln1b_ref[...])

    # ---- FFN: relu(fc1) -> fc2 ----
    hdn = jnp.maximum(_mm(x1, w1_ref[...]) + b1_ref[...], 0.0)   # [T, F]
    ffn = _mm(hdn, w2_ref[...]) + b2_ref[...]                    # [T, C]

    # ---- residual + post-LayerNorm #2 ----
    out_ref[...] = _layer_norm(x1 + ffn, ln2g_ref[...], ln2b_ref[...])


# ------------------------------ wrapper --------------------------------------
def _bcast_spec(shape):
    assert len(shape) == 2
    return pl.BlockSpec(shape, lambda b: (0, 0))


def _batch_spec(tail):
    assert len(tail) == 2
    return pl.BlockSpec((None,) + tail, lambda b: (b, 0, 0))


@jax.jit
def adv_transformer_encoder_layer(x_tbc, pad_mask, params):
    """x_tbc: [T, B, C] float32, pad_mask: [B, T] float32 (1.0 == pad)."""
    (wq, bq, wk, bk, wv, bv, wo, bo,
     ln1g, ln1b, w1, b1, w2, b2, ln2g, ln2b) = params

    hp = jax.lax.Precision.HIGHEST  # exact f32 weight folding

    # Fold out_proj into the value projection per head:
    #   Wvo_h = wv_h.T @ wo_h.T  ([C, C]),  bvo_h = bv_h @ wo_h.T
    wvo_blocks, bvo_blocks = [], []
    for h in range(H):
        wv_h = wv[h * DH:(h + 1) * DH, :]            # [DH, C]
        wo_h = wo[:, h * DH:(h + 1) * DH]            # [C, DH]
        wvo_blocks.append(jnp.matmul(wv_h.T, wo_h.T, precision=hp))  # [C, C]
        bvo_blocks.append(jnp.matmul(bv[h * DH:(h + 1) * DH], wo_h.T,
                                     precision=hp))                   # [C]
    wvo = jnp.concatenate(wvo_blocks, axis=1)        # [C, H*C]
    bvo = jnp.concatenate(bvo_blocks)                # [H*C]

    # Fused projection weight [C, 2C + H*C]; q-scaling folded in; [in, out].
    wz = jnp.concatenate([wq.T * SCALING, wk.T, wvo], axis=1)
    bz = jnp.concatenate([bq * SCALING, bk, bvo]).reshape(1, 2 * C + H * C)

    # Per-batch key-padding bias, replicated across head blocks: [B, 1, H*T].
    kbias = jnp.where(pad_mask > 0.5, -1e9, 0.0).astype(jnp.float32)  # [B, T]
    kbias = jnp.tile(kbias, (1, H)).reshape(B, 1, HT)

    # [T, B, C] -> [B, T, C] so each grid step owns one sequence (parallel
    # across TensorCores on v7x; no cross-batch masked score FLOPs).
    x_btc = jnp.transpose(x_tbc, (1, 0, 2))

    weights = [wz, bz, bo.reshape(1, C),
               ln1g.reshape(1, C), ln1b.reshape(1, C),
               w1.T, b1.reshape(1, F),          # fc1 as [C, F]
               w2.T, b2.reshape(1, C),          # fc2 as [F, C]
               ln2g.reshape(1, C), ln2b.reshape(1, C)]

    out = pl.pallas_call(
        encoder_layer_kernel,
        out_shape=jax.ShapeDtypeStruct((B, T, C), jnp.float32),
        grid=(B,),
        in_specs=([_batch_spec((T, C)), _batch_spec((1, HT))]
                  + [_bcast_spec(w.shape) for w in weights]),
        out_specs=_batch_spec((T, C)),
        scratch_shapes=[pltpu.VMEM((HT, C), jnp.float32),   # K-stack
                        pltpu.VMEM((HT, C), jnp.float32),   # V'-stack
                        pltpu.VMEM((T, HT), jnp.float32)],  # softmax probs
        compiler_params=pltpu.CompilerParams(
            dimension_semantics=("parallel",),
            vmem_limit_bytes=32 * 1024 * 1024),
    )(x_btc, kbias, *weights)

    return jnp.transpose(out, (1, 0, 2))               # back to [T, B, C]


# ------------------------ deterministic parameter init ----------------------
def xavier_uniform(key, out_f, in_f, gain=1.0):
    bound = gain * math.sqrt(6.0 / (in_f + out_f))
    return jax.random.uniform(key, (out_f, in_f), jnp.float32, -bound, bound)


def make_params(key):
    ks = jax.random.split(key, 8)
    g = 1.0 / math.sqrt(2.0)  # fairseq in_proj init gain
    wq = xavier_uniform(ks[0], C, C, g); bq = jnp.zeros((C,), jnp.float32)
    wk = xavier_uniform(ks[1], C, C, g); bk = jnp.zeros((C,), jnp.float32)
    wv = xavier_uniform(ks[2], C, C, g); bv = jnp.zeros((C,), jnp.float32)
    wo = xavier_uniform(ks[3], C, C);    bo = jnp.zeros((C,), jnp.float32)
    ln1g = jnp.ones((C,), jnp.float32);  ln1b = jnp.zeros((C,), jnp.float32)
    w1 = xavier_uniform(ks[4], F, C);    b1 = jnp.zeros((F,), jnp.float32)
    w2 = xavier_uniform(ks[5], C, F);    b2 = jnp.zeros((C,), jnp.float32)
    ln2g = jnp.ones((C,), jnp.float32);  ln2b = jnp.zeros((C,), jnp.float32)
    return (wq, bq, wk, bk, wv, bv, wo, bo,
            ln1g, ln1b, w1, b1, w2, b2, ln2g, ln2b)


# ----------------------------- pure-JAX reference ----------------------------
def reference(x_tbc, pad_mask, params):
    (wq, bq, wk, bk, wv, bv, wo, bo,
     ln1g, ln1b, w1, b1, w2, b2, ln2g, ln2b) = params

    def ln(v, g, b):
        m = jnp.mean(v, -1, keepdims=True)
        var = jnp.mean((v - m) ** 2, -1, keepdims=True)
        return (v - m) / jnp.sqrt(var + LN_EPS) * g + b

    x = jnp.transpose(x_tbc, (1, 0, 2))          # [B, T, C]
    q = (x @ wq.T + bq) * SCALING
    k = x @ wk.T + bk
    v = x @ wv.T + bv
    qh = q.reshape(B, T, H, DH).transpose(0, 2, 1, 3)
    kh = k.reshape(B, T, H, DH).transpose(0, 2, 1, 3)
    vh = v.reshape(B, T, H, DH).transpose(0, 2, 1, 3)
    scores = jnp.einsum("bhqd,bhkd->bhqk", qh, kh)
    scores = jnp.where(pad_mask[:, None, None, :] > 0.5, -1e9, scores)
    p = jax.nn.softmax(scores, axis=-1)
    o = jnp.einsum("bhqk,bhkd->bhqd", p, vh).transpose(0, 2, 1, 3).reshape(B, T, C)
    o = o @ wo.T + bo
    x1 = ln(x + o, ln1g, ln1b)
    f = jnp.maximum(x1 @ w1.T + b1, 0.0) @ w2.T + b2
    x2 = ln(x1 + f, ln2g, ln2b)
    return jnp.transpose(x2, (1, 0, 2))


# --------------------------------- main --------------------------------------
if __name__ == "__main__":
    key = jax.random.PRNGKey(0)
    kx, kp = jax.random.split(key)
    x = jax.random.normal(kx, (T, B, C), jnp.float32)          # [T, B, C]
    # batch 0: no padding; batch 1: last 2 positions padded
    pad_mask = jnp.zeros((B, T), jnp.float32).at[1, T - 2:].set(1.0)
    params = make_params(kp)

    out = adv_transformer_encoder_layer(x, pad_mask, params)
    out = jax.block_until_ready(out)
    assert out.shape == (T, B, C)

    ref = reference(x, pad_mask, params)
    max_err = float(jnp.max(jnp.abs(out - ref)))
    # Softmax is now exact (no approx reciprocal).  Remaining tolerance is
    # headroom for TPU's default (reduced-precision) f32 matmul passes hitting
    # the kernel's fused/folded matmuls and the reference's unfused matmuls
    # with different accumulation structure; with full-f32 matmuls the two
    # agree to ~1e-5.
    assert jnp.allclose(out, ref, atol=5e-3, rtol=5e-3), (
        "mismatch vs reference: max abs err = %f" % max_err)
    print("KERNEL_OK")
</pallas_src>

<mosaic_0001>
module attributes {stable_mosaic.version = 11 : i64} {
  func.func @encoder_layer_kernel(%arg0: i32, %arg1: memref<1x8x32xf32, #tpu.memory_space<vmem>>, %arg2: memref<1x1x32xf32, #tpu.memory_space<vmem>>, %arg3: memref<32x192xf32, #tpu.memory_space<vmem>>, %arg4: memref<1x192xf32, #tpu.memory_space<vmem>>, %arg5: memref<1x32xf32, #tpu.memory_space<vmem>>, %arg6: memref<1x32xf32, #tpu.memory_space<vmem>>, %arg7: memref<1x32xf32, #tpu.memory_space<vmem>>, %arg8: memref<32x64xf32, #tpu.memory_space<vmem>>, %arg9: memref<1x64xf32, #tpu.memory_space<vmem>>, %arg10: memref<64x32xf32, #tpu.memory_space<vmem>>, %arg11: memref<1x32xf32, #tpu.memory_space<vmem>>, %arg12: memref<1x32xf32, #tpu.memory_space<vmem>>, %arg13: memref<1x32xf32, #tpu.memory_space<vmem>>, %arg14: memref<1x8x32xf32, #tpu.memory_space<vmem>>, %arg15: memref<32x32xf32, #tpu.memory_space<vmem>>, %arg16: memref<32x32xf32, #tpu.memory_space<vmem>>, %arg17: memref<8x32xf32, #tpu.memory_space<vmem>>) attributes {dimension_semantics = [#tpu.dimension_semantics<parallel>], iteration_bounds = array<i64: 2>, scalar_prefetch = 0 : i64, scratch_operands = 3 : i64, tpu.core_type = #tpu.core_type<tc>, window_params = [{transform_indices = @transform_0, window_bounds = array<i64: 1, 8, 32>}, {transform_indices = @transform_1, window_bounds = array<i64: 1, 1, 32>}, {pipeline_mode = #tpu.pipeline_mode<synchronous>, transform_indices = @transform_2, window_bounds = array<i64: 32, 192>}, {pipeline_mode = #tpu.pipeline_mode<synchronous>, transform_indices = @transform_3, window_bounds = array<i64: 1, 192>}, {pipeline_mode = #tpu.pipeline_mode<synchronous>, transform_indices = @transform_4, window_bounds = array<i64: 1, 32>}, {pipeline_mode = #tpu.pipeline_mode<synchronous>, transform_indices = @transform_5, window_bounds = array<i64: 1, 32>}, {pipeline_mode = #tpu.pipeline_mode<synchronous>, transform_indices = @transform_6, window_bounds = array<i64: 1, 32>}, {pipeline_mode = #tpu.pipeline_mode<synchronous>, transform_indices = @transform_7, window_bounds = array<i64: 32, 64>}, {pipeline_mode = #tpu.pipeline_mode<synchronous>, transform_indices = @transform_8, window_bounds = array<i64: 1, 64>}, {pipeline_mode = #tpu.pipeline_mode<synchronous>, transform_indices = @transform_9, window_bounds = array<i64: 64, 32>}, {pipeline_mode = #tpu.pipeline_mode<synchronous>, transform_indices = @transform_10, window_bounds = array<i64: 1, 32>}, {pipeline_mode = #tpu.pipeline_mode<synchronous>, transform_indices = @transform_11, window_bounds = array<i64: 1, 32>}, {pipeline_mode = #tpu.pipeline_mode<synchronous>, transform_indices = @transform_12, window_bounds = array<i64: 1, 32>}, {transform_indices = @transform_13, window_bounds = array<i64: 1, 8, 32>}]} {
    %c0 = arith.constant 0 : index
    %c0_0 = arith.constant 0 : index
    %c0_1 = arith.constant 0 : index
    %0 = vector.load %arg1[%c0, %c0_0, %c0_1] : memref<1x8x32xf32, #tpu.memory_space<vmem>>, vector<1x8x32xf32>
    %1 = vector.shape_cast %0 : vector<1x8x32xf32> to vector<8x32xf32>
    %c0_2 = arith.constant 0 : index
    %c0_3 = arith.constant 0 : index
    %2 = vector.load %arg3[%c0_2, %c0_3] : memref<32x192xf32, #tpu.memory_space<vmem>>, vector<32x192xf32>
    %cst = arith.constant dense<0.000000e+00> : vector<8x192xf32>
    %3 = tpu.matmul %1, %2, %cst {dimension_numbers = #tpu.dot_dimension_numbers<[1], [0], [0], [1], [0, 0, 1, 1], [], []>} : vector<8x32xf32>, vector<32x192xf32>, vector<8x192xf32> -> vector<8x192xf32>
    %c0_4 = arith.constant 0 : index
    %c0_5 = arith.constant 0 : index
    %4 = vector.load %arg4[%c0_4, %c0_5] : memref<1x192xf32, #tpu.memory_space<vmem>>, vector<1x192xf32>
    %5 = vector.broadcast %4 : vector<1x192xf32> to vector<8x192xf32>
    %6 = arith.addf %3, %5 : vector<8x192xf32>
    %7 = vector.extract_strided_slice %6 {offsets = [0, 0], sizes = [8, 32], strides = [1, 1]} : vector<8x192xf32> to vector<8x32xf32>
    %8 = vector.extract_strided_slice %6 {offsets = [0, 32], sizes = [8, 32], strides = [1, 1]} : vector<8x192xf32> to vector<8x32xf32>
    %9 = vector.extract_strided_slice %6 {offsets = [0, 64], sizes = [8, 128], strides = [1, 1]} : vector<8x192xf32> to vector<8x128xf32>
    %cst_6 = arith.constant 0.000000e+00 : f32
    %10 = vector.broadcast %cst_6 : f32 to vector<32x32xf32>
    %c0_7 = arith.constant 0 : index
    %c0_8 = arith.constant 0 : index
    %11 = vector.load %arg15[%c0_7, %c0_8] : memref<32x32xf32, #tpu.memory_space<vmem>>, vector<32x32xf32>
    tpu.vector_store %arg15[%c0_7, %c0_8], %10 {strides = array<i32>} : memref<32x32xf32, #tpu.memory_space<vmem>>, vector<32x32xf32>,
    %12 = vector.extract_strided_slice %8 {offsets = [0, 0], sizes = [8, 8], strides = [1, 1]} : vector<8x32xf32> to vector<8x8xf32>
    %c0_9 = arith.constant 0 : index
    %c0_10 = arith.constant 0 : index
    %13 = vector.load %arg15[%c0_9, %c0_10] : memref<32x32xf32, #tpu.memory_space<vmem>>, vector<8x8xf32>
    tpu.vector_store %arg15[%c0_9, %c0_10], %12 {strides = array<i32>} : memref<32x32xf32, #tpu.memory_space<vmem>>, vector<8x8xf32>,
    %14 = vector.extract_strided_slice %9 {offsets = [0, 0], sizes = [8, 32], strides = [1, 1]} : vector<8x128xf32> to vector<8x32xf32>
    %c0_11 = arith.constant 0 : index
    %c0_12 = arith.constant 0 : index
    %15 = vector.load %arg16[%c0_11, %c0_12] : memref<32x32xf32, #tpu.memory_space<vmem>>, vector<8x32xf32>
    tpu.vector_store %arg16[%c0_11, %c0_12], %14 {strides = array<i32>} : memref<32x32xf32, #tpu.memory_space<vmem>>, vector<8x32xf32>,
    %16 = vector.extract_strided_slice %8 {offsets = [0, 8], sizes = [8, 8], strides = [1, 1]} : vector<8x32xf32> to vector<8x8xf32>
    %c8 = arith.constant 8 : index
    %c8_13 = arith.constant 8 : index
    %17 = vector.load %arg15[%c8, %c8_13] : memref<32x32xf32, #tpu.memory_space<vmem>>, vector<8x8xf32>
    tpu.vector_store %arg15[%c8, %c8_13], %16 {strides = array<i32>} : memref<32x32xf32, #tpu.memory_space<vmem>>, vector<8x8xf32>,
    %18 = vector.extract_strided_slice %9 {offsets = [0, 32], sizes = [8, 32], strides = [1, 1]} : vector<8x128xf32> to vector<8x32xf32>
    %c8_14 = arith.constant 8 : index
    %c0_15 = arith.constant 0 : index
    %19 = vector.load %arg16[%c8_14, %c0_15] : memref<32x32xf32, #tpu.memory_space<vmem>>, vector<8x32xf32>
    tpu.vector_store %arg16[%c8_14, %c0_15], %18 {strides = array<i32>} : memref<32x32xf32, #tpu.memory_space<vmem>>, vector<8x32xf32>,
    %20 = vector.extract_strided_slice %8 {offsets = [0, 16], sizes = [8, 8], strides = [1, 1]} : vector<8x32xf32> to vector<8x8xf32>
    %c16 = arith.constant 16 : index
    %c16_16 = arith.constant 16 : index
    %21 = vector.load %arg15[%c16, %c16_16] : memref<32x32xf32, #tpu.memory_space<vmem>>, vector<8x8xf32>
    tpu.vector_store %arg15[%c16, %c16_16], %20 {strides = array<i32>} : memref<32x32xf32, #tpu.memory_space<vmem>>, vector<8x8xf32>,
    %22 = vector.extract_strided_slice %9 {offsets = [0, 64], sizes = [8, 32], strides = [1, 1]} : vector<8x128xf32> to vector<8x32xf32>
    %c16_17 = arith.constant 16 : index
    %c0_18 = arith.constant 0 : index
    %23 = vector.load %arg16[%c16_17, %c0_18] : memref<32x32xf32, #tpu.memory_space<vmem>>, vector<8x32xf32>
    tpu.vector_store %arg16[%c16_17, %c0_18], %22 {strides = array<i32>} : memref<32x32xf32, #tpu.memory_space<vmem>>, vector<8x32xf32>,
    %24 = vector.extract_strided_slice %8 {offsets = [0, 24], sizes = [8, 8], strides = [1, 1]} : vector<8x32xf32> to vector<8x8xf32>
    %c24 = arith.constant 24 : index
    %c24_19 = arith.constant 24 : index
    %25 = vector.load %arg15[%c24, %c24_19] : memref<32x32xf32, #tpu.memory_space<vmem>>, vector<8x8xf32>
    tpu.vector_store %arg15[%c24, %c24_19], %24 {strides = array<i32>} : memref<32x32xf32, #tpu.memory_space<vmem>>, vector<8x8xf32>,
    %26 = vector.extract_strided_slice %9 {offsets = [0, 96], sizes = [8, 32], strides = [1, 1]} : vector<8x128xf32> to vector<8x32xf32>
    %c24_20 = arith.constant 24 : index
    %c0_21 = arith.constant 0 : index
    %27 = vector.load %arg16[%c24_20, %c0_21] : memref<32x32xf32, #tpu.memory_space<vmem>>, vector<8x32xf32>
    tpu.vector_store %arg16[%c24_20, %c0_21], %26 {strides = array<i32>} : memref<32x32xf32, #tpu.memory_space<vmem>>, vector<8x32xf32>,
    %c0_22 = arith.constant 0 : index
    %c0_23 = arith.constant 0 : index
    %28 = vector.load %arg15[%c0_22, %c0_23] : memref<32x32xf32, #tpu.memory_space<vmem>>, vector<32x32xf32>
    %cst_24 = arith.constant dense<0.000000e+00> : vector<8x32xf32>
    %29 = tpu.matmul %7, %28, %cst_24 {dimension_numbers = #tpu.dot_dimension_numbers<[1], [1], [0], [0], [0, 0, 1, 0], [], []>} : vector<8x32xf32>, vector<32x32xf32>, vector<8x32xf32> -> vector<8x32xf32>
    %c0_25 = arith.constant 0 : index
    %c0_26 = arith.constant 0 : index
    %c0_27 = arith.constant 0 : index
    %30 = vector.load %arg2[%c0_25, %c0_26, %c0_27] : memref<1x1x32xf32, #tpu.memory_space<vmem>>, vector<1x1x32xf32>
    %31 = vector.shape_cast %30 : vector<1x1x32xf32> to vector<1x32xf32>
    %32 = vector.broadcast %31 : vector<1x32xf32> to vector<8x32xf32>
    %33 = arith.addf %29, %32 : vector<8x32xf32>
    %34 = vector.extract_strided_slice %33 {offsets = [0, 0], sizes = [8, 8], strides = [1, 1]} : vector<8x32xf32> to vector<8x8xf32>
    %cst_28 = arith.constant dense<0xFF800000> : vector<8xf32>
    %35 = vector.multi_reduction <maximumf>, %34, %cst_28 [1] : vector<8x8xf32> to vector<8xf32>
    %36 = vector.shape_cast %35 : vector<8xf32> to vector<8x1xf32>
    %37 = vector.broadcast %36 : vector<8x1xf32> to vector<8x8xf32>
    %38 = arith.subf %34, %37 : vector<8x8xf32>
    %39 = math.exp %38 : vector<8x8xf32>
    %cst_29 = arith.constant dense<0.000000e+00> : vector<8xf32>
    %40 = vector.multi_reduction <add>, %39, %cst_29 [1] : vector<8x8xf32> to vector<8xf32>
    %41 = vector.shape_cast %40 : vector<8xf32> to vector<8x1xf32>
    %42 = vector.broadcast %41 : vector<8x1xf32> to vector<8x8xf32>
    %43 = arith.divf %39, %42 : vector<8x8xf32>
    %c0_30 = arith.constant 0 : index
    %c0_31 = arith.constant 0 : index
    %44 = vector.load %arg17[%c0_30, %c0_31] : memref<8x32xf32, #tpu.memory_space<vmem>>, vector<8x8xf32>
    tpu.vector_store %arg17[%c0_30, %c0_31], %43 {strides = array<i32>} : memref<8x32xf32, #tpu.memory_space<vmem>>, vector<8x8xf32>,
    %45 = vector.extract_strided_slice %33 {offsets = [0, 8], sizes = [8, 8], strides = [1, 1]} : vector<8x32xf32> to vector<8x8xf32>
    %cst_32 = arith.constant dense<0xFF800000> : vector<8xf32>
    %46 = vector.multi_reduction <maximumf>, %45, %cst_32 [1] : vector<8x8xf32> to vector<8xf32>
    %47 = vector.shape_cast %46 : vector<8xf32> to vector<8x1xf32>
    %48 = vector.broadcast %47 : vector<8x1xf32> to vector<8x8xf32>
    %49 = arith.subf %45, %48 : vector<8x8xf32>
    %50 = math.exp %49 : vector<8x8xf32>
    %cst_33 = arith.constant dense<0.000000e+00> : vector<8xf32>
    %51 = vector.multi_reduction <add>, %50, %cst_33 [1] : vector<8x8xf32> to vector<8xf32>
    %52 = vector.shape_cast %51 : vector<8xf32> to vector<8x1xf32>
    %53 = vector.broadcast %52 : vector<8x1xf32> to vector<8x8xf32>
    %54 = arith.divf %50, %53 : vector<8x8xf32>
    %c0_34 = arith.constant 0 : index
    %c8_35 = arith.constant 8 : index
    %55 = vector.load %arg17[%c0_34, %c8_35] : memref<8x32xf32, #tpu.memory_space<vmem>>, vector<8x8xf32>
    tpu.vector_store %arg17[%c0_34, %c8_35], %54 {strides = array<i32>} : memref<8x32xf32, #tpu.memory_space<vmem>>, vector<8x8xf32>,
    %56 = vector.extract_strided_slice %33 {offsets = [0, 16], sizes = [8, 8], strides = [1, 1]} : vector<8x32xf32> to vector<8x8xf32>
    %cst_36 = arith.constant dense<0xFF800000> : vector<8xf32>
    %57 = vector.multi_reduction <maximumf>, %56, %cst_36 [1] : vector<8x8xf32> to vector<8xf32>
    %58 = vector.shape_cast %57 : vector<8xf32> to vector<8x1xf32>
    %59 = vector.broadcast %58 : vector<8x1xf32> to vector<8x8xf32>
    %60 = arith.subf %56, %59 : vector<8x8xf32>
    %61 = math.exp %60 : vector<8x8xf32>
    %cst_37 = arith.constant dense<0.000000e+00> : vector<8xf32>
    %62 = vector.multi_reduction <add>, %61, %cst_37 [1] : vector<8x8xf32> to vector<8xf32>
    %63 = vector.shape_cast %62 : vector<8xf32> to vector<8x1xf32>
    %64 = vector.broadcast %63 : vector<8x1xf32> to vector<8x8xf32>
    %65 = arith.divf %61, %64 : vector<8x8xf32>
    %c0_38 = arith.constant 0 : index
    %c16_39 = arith.constant 16 : index
    %66 = vector.load %arg17[%c0_38, %c16_39] : memref<8x32xf32, #tpu.memory_space<vmem>>, vector<8x8xf32>
    tpu.vector_store %arg17[%c0_38, %c16_39], %65 {strides = array<i32>} : memref<8x32xf32, #tpu.memory_space<vmem>>, vector<8x8xf32>,
    %67 = vector.extract_strided_slice %33 {offsets = [0, 24], sizes = [8, 8], strides = [1, 1]} : vector<8x32xf32> to vector<8x8xf32>
    %cst_40 = arith.constant dense<0xFF800000> : vector<8xf32>
    %68 = vector.multi_reduction <maximumf>, %67, %cst_40 [1] : vector<8x8xf32> to vector<8xf32>
    %69 = vector.shape_cast %68 : vector<8xf32> to vector<8x1xf32>
    %70 = vector.broadcast %69 : vector<8x1xf32> to vector<8x8xf32>
    %71 = arith.subf %67, %70 : vector<8x8xf32>
    %72 = math.exp %71 : vector<8x8xf32>
    %cst_41 = arith.constant dense<0.000000e+00> : vector<8xf32>
    %73 = vector.multi_reduction <add>, %72, %cst_41 [1] : vector<8x8xf32> to vector<8xf32>
    %74 = vector.shape_cast %73 : vector<8xf32> to vector<8x1xf32>
    %75 = vector.broadcast %74 : vector<8x1xf32> to vector<8x8xf32>
    %76 = arith.divf %72, %75 : vector<8x8xf32>
    %c0_42 = arith.constant 0 : index
    %c24_43 = arith.constant 24 : index
    %77 = vector.load %arg17[%c0_42, %c24_43] : memref<8x32xf32, #tpu.memory_space<vmem>>, vector<8x8xf32>
    tpu.vector_store %arg17[%c0_42, %c24_43], %76 {strides = array<i32>} : memref<8x32xf32, #tpu.memory_space<vmem>>, vector<8x8xf32>,
    %c0_44 = arith.constant 0 : index
    %c0_45 = arith.constant 0 : index
    %78 = vector.load %arg17[%c0_44, %c0_45] : memref<8x32xf32, #tpu.memory_space<vmem>>, vector<8x32xf32>
    %c0_46 = arith.constant 0 : index
    %c0_47 = arith.constant 0 : index
    %79 = vector.load %arg16[%c0_46, %c0_47] : memref<32x32xf32, #tpu.memory_space<vmem>>, vector<32x32xf32>
    %cst_48 = arith.constant dense<0.000000e+00> : vector<8x32xf32>
    %80 = tpu.matmul %78, %79, %cst_48 {dimension_numbers = #tpu.dot_dimension_numbers<[1], [0], [0], [1], [0, 0, 1, 1], [], []>} : vector<8x32xf32>, vector<32x32xf32>, vector<8x32xf32> -> vector<8x32xf32>
    %c0_49 = arith.constant 0 : index
    %c0_50 = arith.constant 0 : index
    %81 = vector.load %arg5[%c0_49, %c0_50] : memref<1x32xf32, #tpu.memory_space<vmem>>, vector<1x32xf32>
    %82 = vector.broadcast %81 : vector<1x32xf32> to vector<8x32xf32>
    %83 = arith.addf %80, %82 : vector<8x32xf32>
    %84 = arith.addf %1, %83 : vector<8x32xf32>
    %c0_51 = arith.constant 0 : index
    %c0_52 = arith.constant 0 : index
    %85 = vector.load %arg6[%c0_51, %c0_52] : memref<1x32xf32, #tpu.memory_space<vmem>>, vector<1x32xf32>
    %c0_53 = arith.constant 0 : index
    %c0_54 = arith.constant 0 : index
    %86 = vector.load %arg7[%c0_53, %c0_54] : memref<1x32xf32, #tpu.memory_space<vmem>>, vector<1x32xf32>
    %cst_55 = arith.constant dense<0.000000e+00> : vector<8xf32>
    %87 = vector.multi_reduction <add>, %84, %cst_55 [1] : vector<8x32xf32> to vector<8xf32>
    %88 = vector.shape_cast %87 : vector<8xf32> to vector<8x1xf32>
    %cst_56 = arith.constant 3.200000e+01 : f32
    %89 = vector.broadcast %cst_56 : f32 to vector<8x1xf32>
    %90 = arith.divf %88, %89 : vector<8x1xf32>
    %91 = vector.broadcast %90 : vector<8x1xf32> to vector<8x32xf32>
    %92 = arith.subf %84, %91 : vector<8x32xf32>
    %93 = arith.mulf %92, %92 : vector<8x32xf32>
    %cst_57 = arith.constant dense<0.000000e+00> : vector<8xf32>
    %94 = vector.multi_reduction <add>, %93, %cst_57 [1] : vector<8x32xf32> to vector<8xf32>
    %95 = vector.shape_cast %94 : vector<8xf32> to vector<8x1xf32>
    %cst_58 = arith.constant 3.200000e+01 : f32
    %96 = vector.broadcast %cst_58 : f32 to vector<8x1xf32>
    %97 = arith.divf %95, %96 : vector<8x1xf32>
    %98 = vector.broadcast %90 : vector<8x1xf32> to vector<8x32xf32>
    %99 = arith.subf %84, %98 : vector<8x32xf32>
    %cst_59 = arith.constant 9.99999974E-6 : f32
    %100 = vector.broadcast %cst_59 : f32 to vector<8x1xf32>
    %101 = arith.addf %97, %100 : vector<8x1xf32>
    %102 = math.rsqrt %101 : vector<8x1xf32>
    %103 = vector.broadcast %102 : vector<8x1xf32> to vector<8x32xf32>
    %104 = arith.mulf %99, %103 : vector<8x32xf32>
    %105 = vector.broadcast %85 : vector<1x32xf32> to vector<8x32xf32>
    %106 = arith.mulf %104, %105 : vector<8x32xf32>
    %107 = vector.broadcast %86 : vector<1x32xf32> to vector<8x32xf32>
    %108 = arith.addf %106, %107 : vector<8x32xf32>
    %c0_60 = arith.constant 0 : index
    %c0_61 = arith.constant 0 : index
    %109 = vector.load %arg8[%c0_60, %c0_61] : memref<32x64xf32, #tpu.memory_space<vmem>>, vector<32x64xf32>
    %cst_62 = arith.constant dense<0.000000e+00> : vector<8x64xf32>
    %110 = tpu.matmul %108, %109, %cst_62 {dimension_numbers = #tpu.dot_dimension_numbers<[1], [0], [0], [1], [0, 0, 1, 1], [], []>} : vector<8x32xf32>, vector<32x64xf32>, vector<8x64xf32> -> vector<8x64xf32>
    %c0_63 = arith.constant 0 : index
    %c0_64 = arith.constant 0 : index
    %111 = vector.load %arg9[%c0_63, %c0_64] : memref<1x64xf32, #tpu.memory_space<vmem>>, vector<1x64xf32>
    %112 = vector.broadcast %111 : vector<1x64xf32> to vector<8x64xf32>
    %113 = arith.addf %110, %112 : vector<8x64xf32>
    %cst_65 = arith.constant 0.000000e+00 : f32
    %114 = vector.broadcast %cst_65 : f32 to vector<8x64xf32>
    %115 = arith.maximumf %113, %114 : vector<8x64xf32>
    %c0_66 = arith.constant 0 : index
    %c0_67 = arith.constant 0 : index
    %116 = vector.load %arg10[%c0_66, %c0_67] : memref<64x32xf32, #tpu.memory_space<vmem>>, vector<64x32xf32>
    %cst_68 = arith.constant dense<0.000000e+00> : vector<8x32xf32>
    %117 = tpu.matmul %115, %116, %cst_68 {dimension_numbers = #tpu.dot_dimension_numbers<[1], [0], [0], [1], [0, 0, 1, 1], [], []>} : vector<8x64xf32>, vector<64x32xf32>, vector<8x32xf32> -> vector<8x32xf32>
    %c0_69 = arith.constant 0 : index
    %c0_70 = arith.constant 0 : index
    %118 = vector.load %arg11[%c0_69, %c0_70] : memref<1x32xf32, #tpu.memory_space<vmem>>, vector<1x32xf32>
    %119 = vector.broadcast %118 : vector<1x32xf32> to vector<8x32xf32>
    %120 = arith.addf %117, %119 : vector<8x32xf32>
    %121 = arith.addf %108, %120 : vector<8x32xf32>
    %c0_71 = arith.constant 0 : index
    %c0_72 = arith.constant 0 : index
    %122 = vector.load %arg12[%c0_71, %c0_72] : memref<1x32xf32, #tpu.memory_space<vmem>>, vector<1x32xf32>
    %c0_73 = arith.constant 0 : index
    %c0_74 = arith.constant 0 : index
    %123 = vector.load %arg13[%c0_73, %c0_74] : memref<1x32xf32, #tpu.memory_space<vmem>>, vector<1x32xf32>
    %cst_75 = arith.constant dense<0.000000e+00> : vector<8xf32>
    %124 = vector.multi_reduction <add>, %121, %cst_75 [1] : vector<8x32xf32> to vector<8xf32>
    %125 = vector.shape_cast %124 : vector<8xf32> to vector<8x1xf32>
    %cst_76 = arith.constant 3.200000e+01 : f32
    %126 = vector.broadcast %cst_76 : f32 to vector<8x1xf32>
    %127 = arith.divf %125, %126 : vector<8x1xf32>
    %128 = vector.broadcast %127 : vector<8x1xf32> to vector<8x32xf32>
    %129 = arith.subf %121, %128 : vector<8x32xf32>
    %130 = arith.mulf %129, %129 : vector<8x32xf32>
    %cst_77 = arith.constant dense<0.000000e+00> : vector<8xf32>
    %131 = vector.multi_reduction <add>, %130, %cst_77 [1] : vector<8x32xf32> to vector<8xf32>
    %132 = vector.shape_cast %131 : vector<8xf32> to vector<8x1xf32>
    %cst_78 = arith.constant 3.200000e+01 : f32
    %133 = vector.broadcast %cst_78 : f32 to vector<8x1xf32>
    %134 = arith.divf %132, %133 : vector<8x1xf32>
    %135 = vector.broadcast %127 : vector<8x1xf32> to vector<8x32xf32>
    %136 = arith.subf %121, %135 : vector<8x32xf32>
    %cst_79 = arith.constant 9.99999974E-6 : f32
    %137 = vector.broadcast %cst_79 : f32 to vector<8x1xf32>
    %138 = arith.addf %134, %137 : vector<8x1xf32>
    %139 = math.rsqrt %138 : vector<8x1xf32>
    %140 = vector.broadcast %139 : vector<8x1xf32> to vector<8x32xf32>
    %141 = arith.mulf %136, %140 : vector<8x32xf32>
    %142 = vector.broadcast %122 : vector<1x32xf32> to vector<8x32xf32>
    %143 = arith.mulf %141, %142 : vector<8x32xf32>
    %144 = vector.broadcast %123 : vector<1x32xf32> to vector<8x32xf32>
    %145 = arith.addf %143, %144 : vector<8x32xf32>
    %c0_80 = arith.constant 0 : index
    %c0_81 = arith.constant 0 : index
    %c0_82 = arith.constant 0 : index
    %146 = vector.load %arg14[%c0_80, %c0_81, %c0_82] : memref<1x8x32xf32, #tpu.memory_space<vmem>>, vector<1x8x32xf32>
    %147 = vector.shape_cast %146 : vector<1x8x32xf32> to vector<8x32xf32>
    %148 = vector.shape_cast %145 : vector<8x32xf32> to vector<1x8x32xf32>
    tpu.vector_store %arg14[%c0_80, %c0_81, %c0_82], %148 {strides = array<i32>} : memref<1x8x32xf32, #tpu.memory_space<vmem>>, vector<1x8x32xf32>,
    return
  }
  func.func @transform_0(%arg0: i32) -> (i32, i32, i32) {
    %c0_i32 = arith.constant 0 : i32
    %c0_i32_0 = arith.constant 0 : i32
    %c0_i32_1 = arith.constant 0 : i32
    return %arg0, %c0_i32, %c0_i32_0 : i32, i32, i32
  }
  func.func @transform_1(%arg0: i32) -> (i32, i32, i32) {
    %c0_i32 = arith.constant 0 : i32
    %c0_i32_0 = arith.constant 0 : i32
    %c0_i32_1 = arith.constant 0 : i32
    return %arg0, %c0_i32, %c0_i32_0 : i32, i32, i32
  }
  func.func @transform_2(%arg0: i32) -> (i32, i32) {
    %c0_i32 = arith.constant 0 : i32
    %c0_i32_0 = arith.constant 0 : i32
    %c0_i32_1 = arith.constant 0 : i32
    return %c0_i32, %c0_i32_0 : i32, i32
  }
  func.func @transform_3(%arg0: i32) -> (i32, i32) {
    %c0_i32 = arith.constant 0 : i32
    %c0_i32_0 = arith.constant 0 : i32
    %c0_i32_1 = arith.constant 0 : i32
    return %c0_i32, %c0_i32_0 : i32, i32
  }
  func.func @transform_4(%arg0: i32) -> (i32, i32) {
    %c0_i32 = arith.constant 0 : i32
    %c0_i32_0 = arith.constant 0 : i32
    %c0_i32_1 = arith.constant 0 : i32
    return %c0_i32, %c0_i32_0 : i32, i32
  }
  func.func @transform_5(%arg0: i32) -> (i32, i32) {
    %c0_i32 = arith.constant 0 : i32
    %c0_i32_0 = arith.constant 0 : i32
    %c0_i32_1 = arith.constant 0 : i32
    return %c0_i32, %c0_i32_0 : i32, i32
  }
  func.func @transform_6(%arg0: i32) -> (i32, i32) {
    %c0_i32 = arith.constant 0 : i32
    %c0_i32_0 = arith.constant 0 : i32
    %c0_i32_1 = arith.constant 0 : i32
    return %c0_i32, %c0_i32_0 : i32, i32
  }
  func.func @transform_7(%arg0: i32) -> (i32, i32) {
    %c0_i32 = arith.constant 0 : i32
    %c0_i32_0 = arith.constant 0 : i32
    %c0_i32_1 = arith.constant 0 : i32
    return %c0_i32, %c0_i32_0 : i32, i32
  }
  func.func @transform_8(%arg0: i32) -> (i32, i32) {
    %c0_i32 = arith.constant 0 : i32
    %c0_i32_0 = arith.constant 0 : i32
    %c0_i32_1 = arith.constant 0 : i32
    return %c0_i32, %c0_i32_0 : i32, i32
  }
  func.func @transform_9(%arg0: i32) -> (i32, i32) {
    %c0_i32 = arith.constant 0 : i32
    %c0_i32_0 = arith.constant 0 : i32
    %c0_i32_1 = arith.constant 0 : i32
    return %c0_i32, %c0_i32_0 : i32, i32
  }
  func.func @transform_10(%arg0: i32) -> (i32, i32) {
    %c0_i32 = arith.constant 0 : i32
    %c0_i32_0 = arith.constant 0 : i32
    %c0_i32_1 = arith.constant 0 : i32
    return %c0_i32, %c0_i32_0 : i32, i32
  }
  func.func @transform_11(%arg0: i32) -> (i32, i32) {
    %c0_i32 = arith.constant 0 : i32
    %c0_i32_0 = arith.constant 0 : i32
    %c0_i32_1 = arith.constant 0 : i32
    return %c0_i32, %c0_i32_0 : i32, i32
  }
  func.func @transform_12(%arg0: i32) -> (i32, i32) {
    %c0_i32 = arith.constant 0 : i32
    %c0_i32_0 = arith.constant 0 : i32
    %c0_i32_1 = arith.constant 0 : i32
    return %c0_i32, %c0_i32_0 : i32, i32
  }
  func.func @transform_13(%arg0: i32) -> (i32, i32, i32) {
    %c0_i32 = arith.constant 0 : i32
    %c0_i32_0 = arith.constant 0 : i32
    %c0_i32_1 = arith.constant 0 : i32
    return %arg0, %c0_i32, %c0_i32_0 : i32, i32, i32
  }
}

</mosaic_0001>

<bundles_post_ra>
// kernel: adv_transformer_encoder_layer.1
= control target key start
LH: loop header
LB: loop body
LE: loop exit
PB: predicated region body
PF: predicated region fallthrough
CT: control target
= control target key end

     0   :  { %s1380_s25 = smov 0   ;;  %s1572_s0 = inlined_call_operand.vmem [shape: f32[2,8,32], index: 0, kind: input, shape index: {}]   ;;  %s1573_s1 = inlined_call_operand.vmem [shape: f32[2,1,32], index: 1, kind: input, shape index: {}]   ;;  %s1574_s2 = inlined_call_operand.vmem [shape: f32[32,192], index: 2, kind: input, shape index: {}]   ;;  %s1575_s3 = inlined_call_operand.vmem [shape: f32[1,192], index: 3, kind: input, shape index: {}]   ;;  %s1576_s4 = inlined_call_operand.vmem [shape: f32[1,32], index: 4, kind: input, shape index: {}]   ;;  %s1577_s5 = inlined_call_operand.vmem [shape: f32[1,32], index: 5, kind: input, shape index: {}]   ;;  %s1578_s6 = inlined_call_operand.vmem [shape: f32[1,32], index: 6, kind: input, shape index: {}]   ;;  %s1579_s7 = inlined_call_operand.vmem [shape: f32[32,64], index: 7, kind: input, shape index: {}]   ;;  %s1580_s8 = inlined_call_operand.vmem [shape: f32[1,64], index: 8, kind: input, shape index: {}]   ;;  %s1581_s9 = inlined_call_operand.vmem [shape: f32[64,32], index: 9, kind: input, shape index: {}]   ;;  %s1582_s10 = inlined_call_operand.vmem [shape: f32[1,32], index: 10, kind: input, shape index: {}]   ;;  %s1583_s11 = inlined_call_operand.vmem [shape: f32[1,32], index: 11, kind: input, shape index: {}]   ;;  %s1584_s12 = inlined_call_operand.vmem [shape: f32[1,32], index: 12, kind: input, shape index: {}]   ;;  %s1585_s13 = inlined_call_operand.vmem [shape: f32[2,8,32], index: 13, kind: output, shape index: {}]  }
   0x1 LB: > { %s1114_s26 = sadd.s32 4294967295, %s1299_s25   ;;  %p1118_p0 = scmp.ge.s32.totalorder %s1299_s25, 1  ;;  %s1299_s25 = sphi %s1380_s25, %s23_s25  }
   0x2   : > { %p394_p1 = scmp.lt.s32.totalorder %s1299_s25, 3 }
   0x4   : > { %p395_p2 = pnand %p1118_p0, %p394_p1 }
   0x5   : > { %v452_v0 = vld [vmem:[%s1574_s2 + $0x8] sm:$0xff] (!%p395_p2)  ;;  %v454_v1 = vld [vmem:[%s1574_s2 + $0x18] sm:$0xff] (!%p395_p2)  ;;  %v451_v2 = vld [vmem:[%s1574_s2] sm:$0xff] (!%p395_p2)  ;;  %p1397_p3 = scmp.lt.s32.totalorder (!%p395_p2), %s1114_s26, 1  ;;  %vm471_vm0 = vcmask (!%p395_p2), 261120   ;;  %v1301_v7 = vmov (!%p395_p2), 0.0   ;;  %v461_v14 = vlaneseq (!%p395_p2) }
   0x6   : > { %398 = sbr.rel (%p395_p2) target bundleno = 2307 (0x903), region = 72  ;;  %v1216_v3 = vpack.c.bf16 (!%p395_p2), %v454_v1, %v452_v0  ;;  %v453_v4 = vld [vmem:[%s1574_s2 + $0x10] sm:$0xff] (!%p395_p2)  ;;  %v456_v5 = vld [vmem:[%s1574_s2 + $0x28] sm:$0xff] (!%p395_p2)  ;;  %v458_v6 = vld [vmem:[%s1574_s2 + $0x38] sm:$0xff] (!%p395_p2)  ;;  %539 = vmatprep.mubr.f32.mxu0 (!%p395_p2), %v1301_v7  ;;  %546 = vst.msk [vmem:[#allocation2] sm:$0xff] (!%p395_p2), %vm471_vm0, %v1301_v7  ;;  %v1302_v16 = vmov (!%p395_p2), 0.0|0.0  }
   0x7   : > { %547 = vst.msk [vmem:[#allocation2 + $0x8] sm:$0xff] (!%p395_p2), %vm471_vm0, %v1301_v7  ;;  %548 = vst.msk [vmem:[#allocation2 + $0x10] sm:$0xff] (!%p395_p2), %vm471_vm0, %v1301_v7  ;;  %v1218_v8 = vpack.c.bf16 (!%p395_p2), %v453_v4, %v451_v2  ;;  %v1220_v9 = vpack.c.bf16 (!%p395_p2), %v458_v6, %v456_v5  ;;  %v455_v10 = vld [vmem:[%s1574_s2 + $0x20] sm:$0xff] (!%p395_p2)  ;;  %v457_v11 = vld [vmem:[%s1574_s2 + $0x30] sm:$0xff] (!%p395_p2)  ;;  %v462_v15 = vshrl.u32 (!%p395_p2), %v461_v14, 7  ;;  %1224 = vmatprep.subr.bf16.mxu1 (!%p395_p2), %v1302_v16  ;;  %s1303_s18 = smov (!%p395_p2), 96  }
   0x8   : > { %549 = vst.msk [vmem:[#allocation2 + $0x18] sm:$0xff] (!%p395_p2), %vm471_vm0, %v1301_v7  ;;  %1217 = vmatprep.subr.bf16.mxu0 (!%p395_p2), %v1216_v3  ;;  %v1222_v12 = vpack.c.bf16 (!%p395_p2), %v457_v11, %v455_v10  ;;  %v459_v18 = vld [vmem:[%s1575_s3] sm:$0x3] (!%p395_p2)  ;;  %vm1304_vm1 = vmmov (!%p395_p2), 0   ;;  %vm554_vm2 = vcmask (!%p395_p2), 64512   ;;  %vm560_vm3 = vcmask (!%p395_p2), 130112   ;;  %vm1226_vm6 = vmpackc.low (!%p395_p2), %vm471_vm0, %vm471_vm0 }
   0x9   : > { %1219 = vmatpush1.bf16.msra.mxu0 (!%p395_p2), %v1218_v8  ;;  %v463_v17 = vsub.s32 (!%p395_p2), 0, %v462_v15  ;;  %v467_v19 = vsub.s32 (!%p395_p2), 1, %v462_v15  ;;  %1172 = vmatprep.mubr.msk.f32.mxu1 (!%p395_p2), %vm1304_vm1, %v1301_v7  ;;  %vm566_vm4 = vcmask (!%p395_p2), 195712   ;;  %vm569_vm5 = vcmask (!%p395_p2), 261312   ;;  %s1305_s22 = smov (!%p395_p2), 120   ;;  %s1306_s23 = smov (!%p395_p2), 112  }
   0xa   : > { %1221 = vmatprep.subr.bf16.mxu0 (!%p395_p2), %v1220_v9  ;;  %s1307_s24 = smov (!%p395_p2), 104   ;;  %s1308_s27 = smov (!%p395_p2), 64   ;;  %vm947_vm7 = vcmask (!%p395_p2), 523264  }
   0xb   : > { %v464_v20 = vrot.slane (!%p395_p2), %v459_v18, %v463_v17  ;;  %v468_v21 = vrot.slane (!%p395_p2), %v459_v18, %v467_v19  ;;  %s1309_s28 = smov (!%p395_p2), 32  }
   0xd   : > { %s1588_s26 = smov (!%p1397_p3, %s1114_s26), 1  ;;  %1223 = vmatpush1.bf16.msra.mxu0 %v1222_v12 }
   0xe   : > { %s1119_s29 = sshll.u32 %s1588_s26, 3  ;;  %1232 = vmatprep.subr.bf16.mxu0 %v1302_v16  ;;  %s445_s21 = scalar_lea.vmem %s1573_s1, %s1588_s26 }
   0xf   : > { %s442_s15 = scalar_lea.vmem %s1572_s0, %s1119_s29  ;;  %v1122_v33 = vld [vmem:[%s445_s21] ss:$0 sm:$0xff] }
  0x10   : > { %v1435_v13 = vld [vmem:[%s442_s15] sm:$0xff] }
  0x11   : > { %1121 = vmatmul.mubr.msk.f32.vlgmr.msra.gmra.mrb[0].mxu0 %vm471_vm0, %v1435_v13 }
  0x12   : > { %1183 = vmatprep.mubr.msk.f32.mxu0 %vm1304_vm1, %v1301_v7 }
  0xe4   : > { %v541_v22 = vpop.f32.mrb[0].mxu0 }
  0xe5   : > { %v1444_v23 = vadd.f32 %v541_v22, %v464_v20  ;;  %v543_v24 = vpop.f32.mrb[1].mxu0 }
  0xe6   : > { %v1446_v25 = vadd.f32 %v543_v24, %v468_v21 }
  0xe7   : > { %551 = vrot.lane.b32.xlu0 %v1444_v23, %s1303_s18 }
  0xe8   : > { %568 = vst.msk [vmem:[#allocation3 + $0x10] sm:$0xff] %vm471_vm0, %v1446_v25 }
  0xef   : > { %v734_v21 = vld [vmem:[#allocation3 + $0x10] sm:$0xff] }
 0x159   : > { %v552_v26 = vpop.permute.xlu0 %551 }
 0x15a   : > { %555 = vst.msk [vmem:[#allocation2] sm:$0xff] %vm554_vm2, %v552_v26 }
 0x15b   : > { %561 = vst.msk [vmem:[#allocation2 + $0x8] sm:$0xff] %vm560_vm3, %v552_v26 }
 0x15c   : > { %567 = vst.msk [vmem:[#allocation2 + $0x10] sm:$0xff] %vm566_vm4, %v552_v26 }
 0x15d   : > { %570 = vst.msk [vmem:[#allocation2 + $0x18] sm:$0xff] %vm569_vm5, %v552_v26 }
 0x161   : > { %v576_v27 = vld [vmem:[#allocation2] sm:$0xff] }
 0x162   : > { %v577_v28 = vld [vmem:[#allocation2 + $0x8] sm:$0xff] }
 0x163   : > { %v1225_v29 = vpack.c.bf16 %v577_v28, %v576_v27  ;;  %v578_v30 = vld [vmem:[#allocation2 + $0x10] sm:$0xff] }
 0x164   : > { %v579_v31 = vld [vmem:[#allocation2 + $0x18] sm:$0xff] }
 0x165   : > { %1227 = vmatpush3.bf16.xpose.msk.msra.mxu1 %vm1226_vm6, %v1225_v29  ;;  %v1229_v32 = vpack.c.bf16 %v579_v31, %v578_v30 }
 0x166   : > { %1228 = vmatprep.subr.bf16.mxu1 %v1302_v16 }
 0x16d   : > { %1231 = vmatpush3.bf16.xpose.msk.msra.mxu1 %vm1226_vm6, %v1229_v32 }
 0x16e   : > { %1244 = vmatprep.subr.bf16.mxu1 %v1302_v16 }
 0x174   : > { %1173 = vmatmul.mubr.msk.f32.vlgmr.msra.gmra.mrb[0].mxu1 %vm471_vm0, %v1444_v23 }
 0x175   : > { %1213 = vmatprep.mubr.msk.f32.mxu1 %vm1304_vm1, %v1301_v7 }
 0x247   : > { %v667_v34 = vpop.f32.mrb[0].mxu1 }
 0x248   : > { %v668_v35 = vadd.f32 %v1122_v33, %v667_v34  ;;  %v1174_v36 = vpop.f32.mrb[1].mxu1 }
 0x249   : > { %v848_v36 = vld [vmem:[%s1579_s7 + $0x8] sm:$0xff] }
 0x24a   : > { %v699_v37 = vsel %vm566_vm4, %v668_v35, -inf  ;;  %v683_v38 = vsel %vm560_vm3, %v668_v35, -inf  ;;  %v715_v39 = vsel %vm569_vm5, %v668_v35, -inf  ;;  %v671_v40 = vsel %vm554_vm2, %v668_v35, -inf }
 0x24b   : > { %700 = vmax.xlane.f32.xlu1 %v699_v37  ;;  %684 = vmax.xlane.f32.xlu0 %v683_v38  ;;  %v850_v38 = vld [vmem:[%s1579_s7 + $0x18] sm:$0xff] }
 0x24f   : > { %716 = vmax.xlane.f32.xlu1 %v715_v39 }
 0x253   : > { %672 = vmax.xlane.f32.xlu1 %v671_v40  ;;  %v932_v40 = vld [vmem:[%s1581_s9] sm:$0xff] }
 0x2d8   : > { %v701_v41 = vpop.xlane.xlu1 %700  ;;  %v685_v42 = vpop.xlane.xlu0 %684 }
 0x2d9   : > { %v686_v43 = vsub.f32 %v668_v35, %v685_v42  ;;  %v702_v44 = vsub.f32 %v668_v35, %v701_v41  ;;  %v933_v41 = vld [vmem:[%s1581_s9 + $0x8] sm:$0xff]  ;;  %v934_v42 = vld [vmem:[%s1581_s9 + $0x10] sm:$0xff] }
 0x2db   : > { %v687_v45 = vmul.f32 1.442695, %v686_v43  ;;  %v703_v47 = vmul.f32 1.442695, %v702_v44  ;;  %v1245_v43 = vpack.c.bf16 %v933_v41, %v932_v40  ;;  %v935_v44 = vld [vmem:[%s1581_s9 + $0x18] sm:$0xff] }
 0x2dc   : > { %v717_v46 = vpop.xlane.xlu1 %716 }
 0x2dd   : > { %1273 = vpow2.f32 %v687_v45  ;;  %v718_v48 = vsub.f32 %v668_v35, %v717_v46  ;;  %1246 = vmatpush3.bf16.msra.mxu1 %v1245_v43  ;;  %v1248_v45 = vpack.c.bf16 %v935_v44, %v934_v42  ;;  %v936_v46 = vld [vmem:[%s1581_s9 + $0x20] sm:$0xff] }
 0x2de   : > { %1275 = vpow2.f32 %v703_v47  ;;  %1247 = vmatprep.subr.bf16.mxu1 %v1302_v16  ;;  %v937_v47 = vld [vmem:[%s1581_s9 + $0x28] sm:$0xff] }
 0x2df   : > { %v719_v51 = vmul.f32 1.442695, %v718_v48  ;;  %v1251_v48 = vpack.c.bf16 %v937_v47, %v936_v46 }
 0x2e0   : > { %v673_v49 = vpop.xlane.xlu1 %672 }
 0x2e1   : > { %v674_v50 = vsub.f32 %v668_v35, %v673_v49  ;;  %1249 = vmatpush3.bf16.msra.mxu1 %v1248_v45 }
 0x2e2   : > { %1250 = vmatprep.subr.bf16.mxu1 %v1302_v16 }
 0x2e3   : > { %v675_v52 = vmul.f32 1.442695, %v674_v50 }
 0x2e5   : > { %1277 = vpow2.f32 %v675_v52  ;;  %1252 = vmatpush3.bf16.msra.mxu1 %v1251_v48 }
 0x2e6   : > { %1279 = vpow2.f32 %v719_v51  ;;  %1253 = vmatprep.subr.bf16.mxu1 %v1302_v16 }
 0x2e7   : > { %v1274_v53 = vpop.eup %1273 }
 0x2e8   : > { %690 = vrot.lane.b32.xlu1 %v1274_v53, %s1305_s22  ;;  %v1276_v54 = vpop.eup %1275 }
 0x2ec   : > { %706 = vrot.lane.b32.xlu1 %v1276_v54, %s1306_s23 }
 0x2ef   : > { %v1278_v55 = vpop.eup %1277 }
 0x2f0   : > { %v1280_v56 = vpop.eup %1279  ;;  %v677_v57 = vsel %vm554_vm2, %v1278_v55, 0.0 }
 0x2f1   : > { %722 = vrot.lane.b32.xlu1 %v1280_v56, %s1307_s24  ;;  %678 = vadd.xlane.f32.xlu0 %v677_v57 }
 0x307   : > { %556 = vrot.lane.b32.xlu0 %v1444_v23, %s1308_s27  ;;  %s449_s27 = scalar_lea.vmem %s1585_s13, %s1119_s29 }
 0x30b   : > { %562 = vrot.lane.b32.xlu0 %v1444_v23, %s1309_s28 }
 0x35a   : > { %v691_v58 = vpop.permute.xlu1 %690 }
 0x35b   : > { %v693_v59 = vsel %vm554_vm2, %v691_v58, 0.0  ;;  %v939_v58 = vld [vmem:[%s1581_s9 + $0x38] sm:$0xff] }
 0x35c   : > { %694 = vadd.xlane.f32.xlu1 %v693_v59 }
 0x35e   : > { %v707_v60 = vpop.permute.xlu1 %706 }
 0x35f   : > { %v709_v61 = vsel %vm554_vm2, %v707_v60, 0.0  ;;  %v1132_v60 = vld [vmem:[%s1580_s8] ss:$0 sm:$0xff] }
 0x360   : > { %710 = vadd.xlane.f32.xlu0 %v709_v61 }
 0x363   : > { %v723_v62 = vpop.permute.xlu1 %722 }
 0x364   : > { %v725_v63 = vsel %vm554_vm2, %v723_v62, 0.0 }
 0x365   : > { %726 = vadd.xlane.f32.xlu0 %v725_v63 }
 0x37b   : > { %572 = vrot.lane.b32.xlu0 %v1446_v25, %s1303_s18  ;;  %v1128_v25 = vld [vmem:[%s1576_s4] ss:$0 sm:$0xff] }
 0x37e   : > { %v679_v0 = vpop.xlane.xlu0 %678 }
 0x37f   : > { %1281 = vrcp.f32 %v679_v0 }
 0x382   : > { %v557_v1 = vpop.permute.xlu0 %556 }
 0x383   : > { %559 = vst.msk [vmem:[#allocation3] sm:$0xff] %vm471_vm0, %v557_v1  ;;  %v1134_v1 = vld [vmem:[%s1582_s10] ss:$0 sm:$0xff] }
 0x386   : > { %v563_v2 = vpop.permute.xlu0 %562 }
 0x387   : > { %565 = vst.msk [vmem:[#allocation3 + $0x8] sm:$0xff] %vm471_vm0, %v563_v2 }
 0x389   : > { %v1282_v3 = vpop.eup %1281 }
 0x38a   : > { %v681_v4 = vmul.f32 %v1282_v3, %v1278_v55  ;;  %v732_v5 = vld [vmem:[#allocation3] sm:$0xff] }
 0x38b   : > { %v1131_v55 = vld [vmem:[%s1578_s6] ss:$0 sm:$0xff] }
 0x38c   : > { %682 = vst.msk [vmem:[#allocation4] sm:$0xff] %vm554_vm2, %v681_v4 }
 0x38e   : > { %v733_v6 = vld [vmem:[#allocation3 + $0x8] sm:$0xff] }
 0x38f   : > { %v1233_v8 = vpack.c.bf16 %v733_v6, %v732_v5 }
 0x391   : > { %1234 = vmatpush3.bf16.msra.mxu0 %v1233_v8 }
 0x392   : > { %1235 = vmatprep.subr.bf16.mxu0 %v1302_v16 }
 0x3e9   : > { %v695_v9 = vpop.xlane.xlu1 %694 }
 0x3ea   : > { %1283 = vrcp.f32 %v695_v9 }
 0x3ed   : > { %v711_v10 = vpop.xlane.xlu0 %710 }
 0x3ee   : > { %1285 = vrcp.f32 %v711_v10 }
 0x3f2   : > { %v727_v11 = vpop.xlane.xlu0 %726 }
 0x3f3   : > { %1287 = vrcp.f32 %v727_v11 }
 0x3f4   : > { %v1284_v12 = vpop.eup %1283 }
 0x3f5   : > { %v697_v14 = vmul.f32 %v1284_v12, %v1274_v53  ;;  %v1130_v53 = vld [vmem:[%s1577_s5] ss:$0 sm:$0xff] }
 0x3f6   : > { %v573_v15 = vpop.permute.xlu0 %572 }
 0x3f7   : > { %575 = vst.msk [vmem:[#allocation3 + $0x18] sm:$0xff] %vm471_vm0, %v573_v15 }
 0x3f8   : > { %698 = vst.msk [vmem:[#allocation4] sm:$0xff] %vm560_vm3, %v697_v14  ;;  %v1286_v17 = vpop.eup %1285 }
 0x3f9   : > { %v713_v18 = vmul.f32 %v1286_v17, %v1276_v54 }
 0x3fb   : > { %714 = vst.msk [vmem:[#allocation4] sm:$0xff] %vm566_vm4, %v713_v18 }
 0x3fd   : > { %v1288_v19 = vpop.eup %1287 }
 0x3fe   : > { %v729_v20 = vmul.f32 %v1288_v19, %v1280_v56  ;;  %v735_v22 = vld [vmem:[#allocation3 + $0x18] sm:$0xff]  ;;  %v1136_v19 = vld [vmem:[%s1583_s11] ss:$0 sm:$0xff] }
 0x3ff   : > { %v1236_v23 = vpack.c.bf16 %v735_v22, %v734_v21  ;;  %v1137_v21 = vld [vmem:[%s1584_s12] ss:$0 sm:$0xff] }
 0x400   : > { %730 = vst.msk [vmem:[#allocation4] sm:$0xff] %vm569_vm5, %v729_v20 }
 0x401   : > { %1237 = vmatpush3.bf16.msra.mxu0 %v1236_v23 }
 0x402   : > { %1238 = vmatprep.subr.bf16.mxu0 %v1302_v16 }
 0x407   : > { %v731_v24 = vld [vmem:[#allocation4] sm:$0xff] }
 0x408   : > { %1184 = vmatmul.mubr.msk.f32.vlgmr.msra.gmra.mrb[2].mxu0 %vm471_vm0, %v731_v24 }
 0x409   : > { %1194 = vmatprep.mubr.msk.f32.mxu0 %vm1304_vm1, %v1301_v7  ;;  %v847_v7 = vld [vmem:[%s1579_s7] sm:$0xff] }
 0x40a   : > { %v1239_v37 = vpack.c.bf16 %v848_v36, %v847_v7 }
 0x40c   : > { %1240 = vmatpush3.bf16.msra.mxu0 %v1239_v37 }
 0x40d   : > { %1241 = vmatprep.subr.bf16.mxu0 %v1302_v16  ;;  %v938_v16 = vld [vmem:[%s1581_s9 + $0x30] sm:$0xff] }
 0x40e   : > { %v1254_v59 = vpack.c.bf16 %v939_v58, %v938_v16 }
 0x410   : > { %1255 = vmatpush3.bf16.msra.mxu1 %v1254_v59 }
 0x4db   : > { %v812_v26 = vpop.f32.mrb[2].mxu0 }
 0x4dc   : > { %v813_v27 = vadd.f32 %v1128_v25, %v812_v26  ;;  %v1185_v28 = vpop.f32.mrb[3].mxu0 }
 0x4de   : > { %v816_v29 = vadd.f32 %v813_v27, %v1435_v13  ;;  %v849_v13 = vld [vmem:[%s1579_s7 + $0x10] sm:$0xff] }
 0x4df   : > { %v1242_v39 = vpack.c.bf16 %v850_v38, %v849_v13 }
 0x4e0   : > { %v819_v30 = vsel %vm471_vm0, %v816_v29, 0.0 }
 0x4e1   : > { %820 = vadd.xlane.f32.xlu1 %v819_v30  ;;  %1243 = vmatpush3.bf16.msra.mxu0 %v1242_v39 }
 0x56e   : > { %v821_v31 = vpop.xlane.xlu1 %820 }
 0x56f   : > { %v823_v32 = vmul.f32 0.03125, %v821_v31 }
 0x571   : > { %v824_v33 = vsub.f32 %v816_v29, %v823_v32 }
 0x573   : > { %v825_v34 = vmul.f32 %v824_v33, %v824_v33 }
 0x575   : > { %v826_v35 = vsel %vm471_vm0, %v825_v34, 0.0 }
 0x576   : > { %827 = vadd.xlane.f32.xlu0 %v826_v35 }
 0x603   : > { %v828_v49 = vpop.xlane.xlu0 %827 }
 0x604   : > { %v829_v50 = vmul.f32 0.03125, %v828_v49 }
 0x606   : > { %v830_v51 = vadd.f32 1e-05, %v829_v50 }
 0x608   : > { %1289 = vrsqrt.f32 %v830_v51 }
 0x612   : > { %v1290_v52 = vpop.eup %1289 }
 0x613   : > { %v832_v54 = vmul.f32 %v1290_v52, %v824_v33 }
 0x615   : > { %v839_v56 = vmul.f32 %v1130_v53, %v832_v54 }
 0x617   : > { %v846_v57 = vadd.f32 %v1131_v55, %v839_v56 }
 0x619   : > { %1195 = vmatmul.mubr.msk.f32.vlgmr.msra.gmra.mrb[4].mxu0 %vm471_vm0, %v846_v57 }
 0x6ec   : > { %v927_v61 = vpop.f32.mrb[4].mxu0 }
 0x6ed   : > { %v928_v62 = vadd.f32 %v1132_v60, %v927_v61  ;;  %v1196_v63 = vpop.f32.mrb[5].mxu0 }
 0x6ef   : > { %v931_v0 = vmax.f32 %v928_v62, 0.0 }
 0x6f1   : > { %1214 = vmatmul.mubr.msk.f32.vlgmr.msra.gmra.mrb[2].mxu1 %vm947_vm7, %v931_v0 }
 0x7c4   : > { %v1017_v2 = vpop.f32.mrb[2].mxu1 }
 0x7c5   : > { %v1018_v3 = vadd.f32 %v1134_v1, %v1017_v2  ;;  %v1215_v4 = vpop.f32.mrb[3].mxu1 }
 0x7c7   : > { %v1021_v5 = vadd.f32 %v1018_v3, %v846_v57 }
 0x7c9   : > { %v1024_v6 = vsel %vm471_vm0, %v1021_v5, 0.0 }
 0x7ca   : > { %1025 = vadd.xlane.f32.xlu1 %v1024_v6 }
 0x857   : > { %v1026_v8 = vpop.xlane.xlu1 %1025 }
 0x858   : > { %v1027_v9 = vmul.f32 0.03125, %v1026_v8 }
 0x85a   : > { %v1028_v10 = vsub.f32 %v1021_v5, %v1027_v9 }
 0x85c   : > { %v1029_v11 = vmul.f32 %v1028_v10, %v1028_v10 }
 0x85e   : > { %v1030_v12 = vsel %vm471_vm0, %v1029_v11, 0.0 }
 0x85f   : > { %1031 = vadd.xlane.f32.xlu1 %v1030_v12 }
 0x8ec   : > { %v1032_v14 = vpop.xlane.xlu1 %1031 }
 0x8ed   : > { %v1033_v15 = vmul.f32 0.03125, %v1032_v14 }
 0x8ef   : > { %v1034_v17 = vadd.f32 1e-05, %v1033_v15 }
 0x8f1   : > { %1291 = vrsqrt.f32 %v1034_v17 }
 0x8fb   : > { %v1292_v18 = vpop.eup %1291 }
 0x8fc   : > { %v1036_v20 = vmul.f32 %v1292_v18, %v1028_v10 }
 0x8fe   : > { %v1043_v22 = vmul.f32 %v1136_v19, %v1036_v20 }
 0x900   : > { %v1050_v23 = vadd.f32 %v1137_v21, %v1043_v22 }
 0x902   : > { %1051 = vst.msk [vmem:[%s449_s27] sm:$0xff] %vm471_vm0, %v1050_v23 }
 0x903 PF: > { %s23_s25 = sadd.s32 1, %s1299_s25  }
 0x904   : > { %p20_p4 = scmp.ge.s32.totalorder %s23_s25, 4  }
 0x906   :  { %22 = sbr.rel (!%p20_p4) target bundleno = 1 (0x1), region = 105 }

</bundles_post_ra>
